<compile_context>
chip_gen: v7x
topology: tpu7x:2x2x1
jax: 0.10.0
libtpu: 0.0.40
codegen_flags: <defaults>
</compile_context>

<pallas_src>
from functools import partial

import jax
import jax.numpy as jnp
from jax.experimental import pallas as pl
from jax.experimental.pallas import tpu as pltpu


def _round_up(a, b):
    return (a + b - 1) // b * b


def basic_block_kernel(x_ref, mask_ref, w1_ref, s1_ref, b1_ref,
                       w2_ref, s2_ref, b2_ref, o_ref, y1_ref,
                       *, Wp, P_out, ML, MS):
    """One image per grid step.

    x_ref   : (1, Cin, Pw)    bf16 padded-flat input slab (zero margins)
    mask_ref: (1, P_out)      f32, 1.0 on real pixels, 0.0 on pad ring / lane tail
    w*_ref  : (3, Cout, 3*C)  bf16; kw-major, kh folded into the contraction dim
    s*/b*   : (Cout, 1)       f32 folded BatchNorm scale / bias
    o_ref   : (1, Cout, P_out) f32 output slab (ring/tail columns finite but unused)
    y1_ref  : (Cout, Ws)      bf16 VMEM scratch for the conv1 intermediate
    """
    Cout = y1_ref.shape[0]
    Ws = y1_ref.shape[1]
    mask = mask_ref[...]                                     # (1, P_out) f32

    # ---- conv1: 3 MXU matmuls, contraction K = 3*Cin (row taps folded in) ----
    acc = None
    for kw in range(3):
        base = ML + (kw - 1)
        rhs = jnp.concatenate(
            [x_ref[0, :, base + (kh - 1) * Wp: base + (kh - 1) * Wp + P_out]
             for kh in range(3)], axis=0)                    # (3*Cin, P_out) bf16
        d = jnp.dot(w1_ref[kw], rhs, preferred_element_type=jnp.float32)
        acc = d if acc is None else acc + d

    # BN1 + ReLU in f32; the mask zeroes the pad ring (it acts as conv2's padding)
    # and the [P, P_out) lane tail, so the stored intermediate is fully defined.
    y1 = jnp.maximum(acc * s1_ref[...] + b1_ref[...], 0.0) * mask

    # Scratch margins are read by conv2's shifted slices (they only feed the
    # discarded ring/tail output columns) -> keep them zero.  Done every step,
    # unconditionally, so it is safe under a "parallel" batch axis (megacore).
    y1_ref[:, :MS] = jnp.zeros((Cout, MS), jnp.bfloat16)
    y1_ref[:, MS + P_out:Ws] = jnp.zeros((Cout, Ws - MS - P_out), jnp.bfloat16)
    y1_ref[:, MS:MS + P_out] = y1.astype(jnp.bfloat16)       # lane-aligned store

    # ---- conv2: same 3 folded matmuls on the bf16 intermediate ----
    acc2 = None
    for kw in range(3):
        base = MS + (kw - 1)
        rhs = jnp.concatenate(
            [y1_ref[:, base + (kh - 1) * Wp: base + (kh - 1) * Wp + P_out]
             for kh in range(3)], axis=0)                    # (3*Cout, P_out) bf16
        d = jnp.dot(w2_ref[kw], rhs, preferred_element_type=jnp.float32)
        acc2 = d if acc2 is None else acc2 + d

    # BN2 + residual (identity from the same bf16 slab, upcast to f32) + ReLU.
    ident = x_ref[0, :, ML:ML + P_out].astype(jnp.float32)
    o_ref[0] = jnp.maximum(acc2 * s2_ref[...] + b2_ref[...] + ident, 0.0)


def basic_block_forward(x_nchw, params, eps=1e-5):
    """BasicBlock forward. x_nchw: (N, C, H, W) float32; returns (N, C, H, W) f32."""
    N, Cin, H, W = x_nchw.shape
    Cout = params["w1"].shape[0]
    assert Cin == Cout, "BasicBlock with downsample=None requires inplanes == planes"

    Wp = W + 2
    P = (H + 2) * Wp                         # padded-flat spatial size
    P_out = _round_up(P, 128)                # lane-dense compute / store width
    # Margins expressed as extra zero ROWS so a single jnp.pad builds the slab:
    #   left  margin = rt*Wp  >= Wp + 1
    #   right margin = rb*Wp  >= Wp + 1 + (P_out - P)
    rt = 2
    rb = 1 + -(-(P_out - P + 1) // Wp)
    ML = rt * Wp
    Pw = (H + 2 + rt + rb) * Wp

    # Single fused pad pass, already in bf16 (halves input HBM traffic).
    xb = x_nchw.astype(jnp.bfloat16)
    x_wide = jnp.pad(xb, ((0, 0), (0, 0), (1 + rt, 1 + rb), (1, 1))).reshape(N, Cin, Pw)

    # Interior mask in padded-flat coordinates (zero on ring and on [P, P_out)).
    mask = jnp.pad(jnp.ones((H, W), jnp.float32), ((1, 1), (1, 1))).reshape(1, P)
    mask = jnp.pad(mask, ((0, 0), (0, P_out - P)))

    # Weights OIHW (Cout, Cin, 3, 3) -> (kw, Cout, kh*Cin + cin): kh folded into K.
    w1 = jnp.transpose(params["w1"], (3, 0, 2, 1)).reshape(3, Cout, 3 * Cin).astype(jnp.bfloat16)
    w2 = jnp.transpose(params["w2"], (3, 0, 2, 1)).reshape(3, Cout, 3 * Cout).astype(jnp.bfloat16)

    # Fold eval-mode BatchNorm (running stats) into per-channel scale & bias (f32).
    s1 = params["g1"] / jnp.sqrt(params["v1"] + eps)
    b1 = params["beta1"] - params["m1"] * s1
    s2 = params["g2"] / jnp.sqrt(params["v2"] + eps)
    b2 = params["beta2"] - params["m2"] * s2
    s1, b1, s2, b2 = (a.reshape(Cout, 1).astype(jnp.float32)
                      for a in (s1, b1, s2, b2))

    # conv1-intermediate scratch: 128-aligned margins -> lane-dense center store.
    MS = _round_up(Wp + 1, 128)
    Ws = MS + P_out + _round_up(Wp + 1, 128)

    kernel = partial(basic_block_kernel, Wp=Wp, P_out=P_out, ML=ML, MS=MS)

    # Per-step VMEM footprint (double-buffered ins/outs + scratch + live values);
    # set the scoped limit explicitly (v7x has only 64 MiB physical per core).
    est = (2 * Cin * Pw * 2                      # input slab block (x2 buffers)
           + 2 * P_out * 4                       # mask
           + 2 * 3 * Cout * 3 * Cin * 2          # w1
           + 2 * 3 * Cout * 3 * Cout * 2         # w2
           + 8 * Cout * 4                        # scale / bias
           + 2 * Cout * P_out * 4                # output block (x2 buffers)
           + Cout * Ws * 2                       # intermediate scratch
           + 3 * Cout * P_out * 2                # live stacked RHS value
           + 2 * Cout * P_out * 4)               # live f32 accumulators
    vmem_limit = int(min(max(2 * est, 32 * 1024 * 1024), 64 * 1024 * 1024))

    out_flat = pl.pallas_call(
        kernel,
        out_shape=jax.ShapeDtypeStruct((N, Cout, P_out), jnp.float32),
        grid_spec=pltpu.PrefetchScalarGridSpec(
            num_scalar_prefetch=0,
            grid=(N,),
            in_specs=[
                pl.BlockSpec((1, Cin, Pw), lambda n: (n, 0, 0)),
                pl.BlockSpec((1, P_out), lambda n: (0, 0)),
                pl.BlockSpec((3, Cout, 3 * Cin), lambda n: (0, 0, 0)),
                pl.BlockSpec((Cout, 1), lambda n: (0, 0)),
                pl.BlockSpec((Cout, 1), lambda n: (0, 0)),
                pl.BlockSpec((3, Cout, 3 * Cout), lambda n: (0, 0, 0)),
                pl.BlockSpec((Cout, 1), lambda n: (0, 0)),
                pl.BlockSpec((Cout, 1), lambda n: (0, 0)),
            ],
            out_specs=pl.BlockSpec((1, Cout, P_out), lambda n: (n, 0, 0)),
            scratch_shapes=[pltpu.VMEM((Cout, Ws), jnp.bfloat16)],
        ),
        compiler_params=pltpu.CompilerParams(
            dimension_semantics=("parallel",),
            vmem_limit_bytes=vmem_limit),
    )(x_wide, mask, w1, s1, b1, w2, s2, b2)

    # Drop the lane tail and pad ring, return NCHW (static slice + reshape).
    return out_flat[:, :, :P].reshape(N, Cout, H + 2, Wp)[:, :, 1:H + 1, 1:W + 1]


def basic_block_reference(x, params, eps=1e-5):
    """Plain-JAX reference in NCHW (mirrors the PyTorch forward, eval-mode BN)."""
    def conv(inp, w):
        return jax.lax.conv_general_dilated(
            inp, w, window_strides=(1, 1), padding=((1, 1), (1, 1)),
            dimension_numbers=("NCHW", "OIHW", "NCHW"),
            precision=jax.lax.Precision.HIGHEST)

    def bn(inp, g, beta, m, v):
        g, beta, m, v = (a[None, :, None, None] for a in (g, beta, m, v))
        return (inp - m) / jnp.sqrt(v + eps) * g + beta

    out = conv(x, params["w1"])
    out = bn(out, params["g1"], params["beta1"], params["m1"], params["v1"])
    out = jax.nn.relu(out)
    out = conv(out, params["w2"])
    out = bn(out, params["g2"], params["beta2"], params["m2"], params["v2"])
    return jax.nn.relu(out + x)


if __name__ == "__main__":
    # Channels chosen as a multiple of the bf16 sublane packing (16) so the
    # kh-stacked sublane concatenation and all stores are tile-aligned (the old
    # Cout=4 toy did not exercise the real layout, per review).
    inplanes = planes = 16
    N, H, W = 2, 16, 16

    key = jax.random.PRNGKey(0)
    keys = jax.random.split(key, 11)
    params = {
        "w1": 0.2 * jax.random.normal(keys[0], (planes, inplanes, 3, 3), jnp.float32),
        "g1": 1.0 + 0.1 * jax.random.normal(keys[1], (planes,), jnp.float32),
        "beta1": 0.1 * jax.random.normal(keys[2], (planes,), jnp.float32),
        "m1": 0.1 * jax.random.normal(keys[3], (planes,), jnp.float32),
        "v1": jax.random.uniform(keys[4], (planes,), jnp.float32, 0.5, 1.5),
        "w2": 0.2 * jax.random.normal(keys[5], (planes, planes, 3, 3), jnp.float32),
        "g2": 1.0 + 0.1 * jax.random.normal(keys[6], (planes,), jnp.float32),
        "beta2": 0.1 * jax.random.normal(keys[7], (planes,), jnp.float32),
        "m2": 0.1 * jax.random.normal(keys[8], (planes,), jnp.float32),
        "v2": jax.random.uniform(keys[9], (planes,), jnp.float32, 0.5, 1.5),
    }
    x = jax.random.normal(keys[10], (N, inplanes, H, W), jnp.float32)

    out = jax.jit(basic_block_forward)(x, params)
    out = jax.block_until_ready(out)

    ref = basic_block_reference(x, params)
    assert out.shape == (N, planes, H, W), out.shape
    # bf16 operand streams (input slab, weights, conv1 intermediate, residual)
    # with f32 MXU accumulation over K = 3*C -> loosened tolerance vs. the
    # f32/HIGHEST reference (per perf review: stream everything in bf16).
    err = jnp.max(jnp.abs(out - ref))
    assert jnp.allclose(out, ref, atol=1.2e-1, rtol=1e-1), f"max abs err = {err}"

    print("KERNEL_OK")
</pallas_src>

<mosaic_0001>
module attributes {stable_mosaic.version = 11 : i64} {
  func.func @basic_block_kernel(%arg0: i32, %arg1: memref<1x16x450xbf16, #tpu.memory_space<vmem>>, %arg2: memref<1x384xf32, #tpu.memory_space<vmem>>, %arg3: memref<3x16x48xbf16, #tpu.memory_space<vmem>>, %arg4: memref<16x1xf32, #tpu.memory_space<vmem>>, %arg5: memref<16x1xf32, #tpu.memory_space<vmem>>, %arg6: memref<3x16x48xbf16, #tpu.memory_space<vmem>>, %arg7: memref<16x1xf32, #tpu.memory_space<vmem>>, %arg8: memref<16x1xf32, #tpu.memory_space<vmem>>, %arg9: memref<1x16x384xf32, #tpu.memory_space<vmem>>, %arg10: memref<16x640xbf16, #tpu.memory_space<vmem>>) attributes {dimension_semantics = [#tpu.dimension_semantics<parallel>], iteration_bounds = array<i64: 2>, scalar_prefetch = 0 : i64, scratch_operands = 1 : i64, tpu.core_type = #tpu.core_type<tc>, window_params = [{transform_indices = @transform_0, window_bounds = array<i64: 1, 16, 450>}, {pipeline_mode = #tpu.pipeline_mode<synchronous>, transform_indices = @transform_1, window_bounds = array<i64: 1, 384>}, {pipeline_mode = #tpu.pipeline_mode<synchronous>, transform_indices = @transform_2, window_bounds = array<i64: 3, 16, 48>}, {pipeline_mode = #tpu.pipeline_mode<synchronous>, transform_indices = @transform_3, window_bounds = array<i64: 16, 1>}, {pipeline_mode = #tpu.pipeline_mode<synchronous>, transform_indices = @transform_4, window_bounds = array<i64: 16, 1>}, {pipeline_mode = #tpu.pipeline_mode<synchronous>, transform_indices = @transform_5, window_bounds = array<i64: 3, 16, 48>}, {pipeline_mode = #tpu.pipeline_mode<synchronous>, transform_indices = @transform_6, window_bounds = array<i64: 16, 1>}, {pipeline_mode = #tpu.pipeline_mode<synchronous>, transform_indices = @transform_7, window_bounds = array<i64: 16, 1>}, {transform_indices = @transform_8, window_bounds = array<i64: 1, 16, 384>}]} {
    %c0 = arith.constant 0 : index
    %c0_0 = arith.constant 0 : index
    %0 = vector.load %arg2[%c0, %c0_0] : memref<1x384xf32, #tpu.memory_space<vmem>>, vector<1x384xf32>
    %c0_1 = arith.constant 0 : index
    %c0_2 = arith.constant 0 : index
    %c17 = arith.constant 17 : index
    %1 = vector.load %arg1[%c0_1, %c0_2, %c17] : memref<1x16x450xbf16, #tpu.memory_space<vmem>>, vector<1x16x384xbf16>
    %2 = vector.shape_cast %1 : vector<1x16x384xbf16> to vector<16x384xbf16>
    %c0_3 = arith.constant 0 : index
    %c0_4 = arith.constant 0 : index
    %c35 = arith.constant 35 : index
    %3 = vector.load %arg1[%c0_3, %c0_4, %c35] : memref<1x16x450xbf16, #tpu.memory_space<vmem>>, vector<1x16x384xbf16>
    %4 = vector.shape_cast %3 : vector<1x16x384xbf16> to vector<16x384xbf16>
    %c0_5 = arith.constant 0 : index
    %c0_6 = arith.constant 0 : index
    %c53 = arith.constant 53 : index
    %5 = vector.load %arg1[%c0_5, %c0_6, %c53] : memref<1x16x450xbf16, #tpu.memory_space<vmem>>, vector<1x16x384xbf16>
    %6 = vector.shape_cast %5 : vector<1x16x384xbf16> to vector<16x384xbf16>
    %7 = tpu.concatenate %2, %4, %6 in 0 : vector<16x384xbf16>, vector<16x384xbf16>, vector<16x384xbf16> -> vector<48x384xbf16>
    %c0_7 = arith.constant 0 : index
    %c0_8 = arith.constant 0 : index
    %c0_9 = arith.constant 0 : index
    %8 = vector.load %arg3[%c0_7, %c0_8, %c0_9] : memref<3x16x48xbf16, #tpu.memory_space<vmem>>, vector<1x16x48xbf16>
    %9 = vector.shape_cast %8 : vector<1x16x48xbf16> to vector<16x48xbf16>
    %cst = arith.constant dense<0.000000e+00> : vector<16x384xf32>
    %10 = tpu.matmul %9, %7, %cst {dimension_numbers = #tpu.dot_dimension_numbers<[1], [0], [0], [1], [0, 0, 1, 1], [], []>} : vector<16x48xbf16>, vector<48x384xbf16>, vector<16x384xf32> -> vector<16x384xf32>
    %c0_10 = arith.constant 0 : index
    %c0_11 = arith.constant 0 : index
    %c18 = arith.constant 18 : index
    %11 = vector.load %arg1[%c0_10, %c0_11, %c18] : memref<1x16x450xbf16, #tpu.memory_space<vmem>>, vector<1x16x384xbf16>
    %12 = vector.shape_cast %11 : vector<1x16x384xbf16> to vector<16x384xbf16>
    %c0_12 = arith.constant 0 : index
    %c0_13 = arith.constant 0 : index
    %c36 = arith.constant 36 : index
    %13 = vector.load %arg1[%c0_12, %c0_13, %c36] : memref<1x16x450xbf16, #tpu.memory_space<vmem>>, vector<1x16x384xbf16>
    %14 = vector.shape_cast %13 : vector<1x16x384xbf16> to vector<16x384xbf16>
    %c0_14 = arith.constant 0 : index
    %c0_15 = arith.constant 0 : index
    %c54 = arith.constant 54 : index
    %15 = vector.load %arg1[%c0_14, %c0_15, %c54] : memref<1x16x450xbf16, #tpu.memory_space<vmem>>, vector<1x16x384xbf16>
    %16 = vector.shape_cast %15 : vector<1x16x384xbf16> to vector<16x384xbf16>
    %17 = tpu.concatenate %12, %14, %16 in 0 : vector<16x384xbf16>, vector<16x384xbf16>, vector<16x384xbf16> -> vector<48x384xbf16>
    %c1 = arith.constant 1 : index
    %c0_16 = arith.constant 0 : index
    %c0_17 = arith.constant 0 : index
    %18 = vector.load %arg3[%c1, %c0_16, %c0_17] : memref<3x16x48xbf16, #tpu.memory_space<vmem>>, vector<1x16x48xbf16>
    %19 = vector.shape_cast %18 : vector<1x16x48xbf16> to vector<16x48xbf16>
    %cst_18 = arith.constant dense<0.000000e+00> : vector<16x384xf32>
    %20 = tpu.matmul %19, %17, %cst_18 {dimension_numbers = #tpu.dot_dimension_numbers<[1], [0], [0], [1], [0, 0, 1, 1], [], []>} : vector<16x48xbf16>, vector<48x384xbf16>, vector<16x384xf32> -> vector<16x384xf32>
    %21 = arith.addf %10, %20 : vector<16x384xf32>
    %c0_19 = arith.constant 0 : index
    %c0_20 = arith.constant 0 : index
    %c19 = arith.constant 19 : index
    %22 = vector.load %arg1[%c0_19, %c0_20, %c19] : memref<1x16x450xbf16, #tpu.memory_space<vmem>>, vector<1x16x384xbf16>
    %23 = vector.shape_cast %22 : vector<1x16x384xbf16> to vector<16x384xbf16>
    %c0_21 = arith.constant 0 : index
    %c0_22 = arith.constant 0 : index
    %c37 = arith.constant 37 : index
    %24 = vector.load %arg1[%c0_21, %c0_22, %c37] : memref<1x16x450xbf16, #tpu.memory_space<vmem>>, vector<1x16x384xbf16>
    %25 = vector.shape_cast %24 : vector<1x16x384xbf16> to vector<16x384xbf16>
    %c0_23 = arith.constant 0 : index
    %c0_24 = arith.constant 0 : index
    %c55 = arith.constant 55 : index
    %26 = vector.load %arg1[%c0_23, %c0_24, %c55] : memref<1x16x450xbf16, #tpu.memory_space<vmem>>, vector<1x16x384xbf16>
    %27 = vector.shape_cast %26 : vector<1x16x384xbf16> to vector<16x384xbf16>
    %28 = tpu.concatenate %23, %25, %27 in 0 : vector<16x384xbf16>, vector<16x384xbf16>, vector<16x384xbf16> -> vector<48x384xbf16>
    %c2 = arith.constant 2 : index
    %c0_25 = arith.constant 0 : index
    %c0_26 = arith.constant 0 : index
    %29 = vector.load %arg3[%c2, %c0_25, %c0_26] : memref<3x16x48xbf16, #tpu.memory_space<vmem>>, vector<1x16x48xbf16>
    %30 = vector.shape_cast %29 : vector<1x16x48xbf16> to vector<16x48xbf16>
    %cst_27 = arith.constant dense<0.000000e+00> : vector<16x384xf32>
    %31 = tpu.matmul %30, %28, %cst_27 {dimension_numbers = #tpu.dot_dimension_numbers<[1], [0], [0], [1], [0, 0, 1, 1], [], []>} : vector<16x48xbf16>, vector<48x384xbf16>, vector<16x384xf32> -> vector<16x384xf32>
    %32 = arith.addf %21, %31 : vector<16x384xf32>
    %c0_28 = arith.constant 0 : index
    %c0_29 = arith.constant 0 : index
    %33 = vector.load %arg4[%c0_28, %c0_29] : memref<16x1xf32, #tpu.memory_space<vmem>>, vector<16x1xf32>
    %34 = vector.broadcast %33 : vector<16x1xf32> to vector<16x384xf32>
    %35 = arith.mulf %32, %34 : vector<16x384xf32>
    %c0_30 = arith.constant 0 : index
    %c0_31 = arith.constant 0 : index
    %36 = vector.load %arg5[%c0_30, %c0_31] : memref<16x1xf32, #tpu.memory_space<vmem>>, vector<16x1xf32>
    %37 = vector.broadcast %36 : vector<16x1xf32> to vector<16x384xf32>
    %38 = arith.addf %35, %37 : vector<16x384xf32>
    %cst_32 = arith.constant 0.000000e+00 : f32
    %39 = vector.broadcast %cst_32 : f32 to vector<16x384xf32>
    %40 = arith.maximumf %38, %39 : vector<16x384xf32>
    %41 = vector.broadcast %0 : vector<1x384xf32> to vector<16x384xf32>
    %42 = arith.mulf %40, %41 : vector<16x384xf32>
    %cst_33 = arith.constant 0.000000e+00 : bf16
    %43 = vector.broadcast %cst_33 : bf16 to vector<16x128xbf16>
    %c0_34 = arith.constant 0 : index
    %c0_35 = arith.constant 0 : index
    %44 = vector.load %arg10[%c0_34, %c0_35] : memref<16x640xbf16, #tpu.memory_space<vmem>>, vector<16x128xbf16>
    tpu.vector_store %arg10[%c0_34, %c0_35], %43 {strides = array<i32>} : memref<16x640xbf16, #tpu.memory_space<vmem>>, vector<16x128xbf16>,
    %cst_36 = arith.constant 0.000000e+00 : bf16
    %45 = vector.broadcast %cst_36 : bf16 to vector<16x128xbf16>
    %c0_37 = arith.constant 0 : index
    %c512 = arith.constant 512 : index
    %46 = vector.load %arg10[%c0_37, %c512] : memref<16x640xbf16, #tpu.memory_space<vmem>>, vector<16x128xbf16>
    tpu.vector_store %arg10[%c0_37, %c512], %45 {strides = array<i32>} : memref<16x640xbf16, #tpu.memory_space<vmem>>, vector<16x128xbf16>,
    %47 = arith.truncf %42 : vector<16x384xf32> to vector<16x384xbf16>
    %c0_38 = arith.constant 0 : index
    %c128 = arith.constant 128 : index
    %48 = vector.load %arg10[%c0_38, %c128] : memref<16x640xbf16, #tpu.memory_space<vmem>>, vector<16x384xbf16>
    tpu.vector_store %arg10[%c0_38, %c128], %47 {strides = array<i32>} : memref<16x640xbf16, #tpu.memory_space<vmem>>, vector<16x384xbf16>,
    %c0_39 = arith.constant 0 : index
    %c109 = arith.constant 109 : index
    %49 = vector.load %arg10[%c0_39, %c109] : memref<16x640xbf16, #tpu.memory_space<vmem>>, vector<16x384xbf16>
    %c0_40 = arith.constant 0 : index
    %c127 = arith.constant 127 : index
    %50 = vector.load %arg10[%c0_40, %c127] : memref<16x640xbf16, #tpu.memory_space<vmem>>, vector<16x384xbf16>
    %c0_41 = arith.constant 0 : index
    %c145 = arith.constant 145 : index
    %51 = vector.load %arg10[%c0_41, %c145] : memref<16x640xbf16, #tpu.memory_space<vmem>>, vector<16x384xbf16>
    %52 = tpu.concatenate %49, %50, %51 in 0 : vector<16x384xbf16>, vector<16x384xbf16>, vector<16x384xbf16> -> vector<48x384xbf16>
    %c0_42 = arith.constant 0 : index
    %c0_43 = arith.constant 0 : index
    %c0_44 = arith.constant 0 : index
    %53 = vector.load %arg6[%c0_42, %c0_43, %c0_44] : memref<3x16x48xbf16, #tpu.memory_space<vmem>>, vector<1x16x48xbf16>
    %54 = vector.shape_cast %53 : vector<1x16x48xbf16> to vector<16x48xbf16>
    %cst_45 = arith.constant dense<0.000000e+00> : vector<16x384xf32>
    %55 = tpu.matmul %54, %52, %cst_45 {dimension_numbers = #tpu.dot_dimension_numbers<[1], [0], [0], [1], [0, 0, 1, 1], [], []>} : vector<16x48xbf16>, vector<48x384xbf16>, vector<16x384xf32> -> vector<16x384xf32>
    %c0_46 = arith.constant 0 : index
    %c110 = arith.constant 110 : index
    %56 = vector.load %arg10[%c0_46, %c110] : memref<16x640xbf16, #tpu.memory_space<vmem>>, vector<16x384xbf16>
    %c0_47 = arith.constant 0 : index
    %c128_48 = arith.constant 128 : index
    %57 = vector.load %arg10[%c0_47, %c128_48] : memref<16x640xbf16, #tpu.memory_space<vmem>>, vector<16x384xbf16>
    %c0_49 = arith.constant 0 : index
    %c146 = arith.constant 146 : index
    %58 = vector.load %arg10[%c0_49, %c146] : memref<16x640xbf16, #tpu.memory_space<vmem>>, vector<16x384xbf16>
    %59 = tpu.concatenate %56, %57, %58 in 0 : vector<16x384xbf16>, vector<16x384xbf16>, vector<16x384xbf16> -> vector<48x384xbf16>
    %c1_50 = arith.constant 1 : index
    %c0_51 = arith.constant 0 : index
    %c0_52 = arith.constant 0 : index
    %60 = vector.load %arg6[%c1_50, %c0_51, %c0_52] : memref<3x16x48xbf16, #tpu.memory_space<vmem>>, vector<1x16x48xbf16>
    %61 = vector.shape_cast %60 : vector<1x16x48xbf16> to vector<16x48xbf16>
    %cst_53 = arith.constant dense<0.000000e+00> : vector<16x384xf32>
    %62 = tpu.matmul %61, %59, %cst_53 {dimension_numbers = #tpu.dot_dimension_numbers<[1], [0], [0], [1], [0, 0, 1, 1], [], []>} : vector<16x48xbf16>, vector<48x384xbf16>, vector<16x384xf32> -> vector<16x384xf32>
    %63 = arith.addf %55, %62 : vector<16x384xf32>
    %c0_54 = arith.constant 0 : index
    %c111 = arith.constant 111 : index
    %64 = vector.load %arg10[%c0_54, %c111] : memref<16x640xbf16, #tpu.memory_space<vmem>>, vector<16x384xbf16>
    %c0_55 = arith.constant 0 : index
    %c129 = arith.constant 129 : index
    %65 = vector.load %arg10[%c0_55, %c129] : memref<16x640xbf16, #tpu.memory_space<vmem>>, vector<16x384xbf16>
    %c0_56 = arith.constant 0 : index
    %c147 = arith.constant 147 : index
    %66 = vector.load %arg10[%c0_56, %c147] : memref<16x640xbf16, #tpu.memory_space<vmem>>, vector<16x384xbf16>
    %67 = tpu.concatenate %64, %65, %66 in 0 : vector<16x384xbf16>, vector<16x384xbf16>, vector<16x384xbf16> -> vector<48x384xbf16>
    %c2_57 = arith.constant 2 : index
    %c0_58 = arith.constant 0 : index
    %c0_59 = arith.constant 0 : index
    %68 = vector.load %arg6[%c2_57, %c0_58, %c0_59] : memref<3x16x48xbf16, #tpu.memory_space<vmem>>, vector<1x16x48xbf16>
    %69 = vector.shape_cast %68 : vector<1x16x48xbf16> to vector<16x48xbf16>
    %cst_60 = arith.constant dense<0.000000e+00> : vector<16x384xf32>
    %70 = tpu.matmul %69, %67, %cst_60 {dimension_numbers = #tpu.dot_dimension_numbers<[1], [0], [0], [1], [0, 0, 1, 1], [], []>} : vector<16x48xbf16>, vector<48x384xbf16>, vector<16x384xf32> -> vector<16x384xf32>
    %71 = arith.addf %63, %70 : vector<16x384xf32>
    %c0_61 = arith.constant 0 : index
    %c0_62 = arith.constant 0 : index
    %c36_63 = arith.constant 36 : index
    %72 = vector.load %arg1[%c0_61, %c0_62, %c36_63] : memref<1x16x450xbf16, #tpu.memory_space<vmem>>, vector<1x16x384xbf16>
    %73 = vector.shape_cast %72 : vector<1x16x384xbf16> to vector<16x384xbf16>
    %74 = arith.extf %73 : vector<16x384xbf16> to vector<16x384xf32>
    %c0_64 = arith.constant 0 : index
    %c0_65 = arith.constant 0 : index
    %75 = vector.load %arg7[%c0_64, %c0_65] : memref<16x1xf32, #tpu.memory_space<vmem>>, vector<16x1xf32>
    %76 = vector.broadcast %75 : vector<16x1xf32> to vector<16x384xf32>
    %77 = arith.mulf %71, %76 : vector<16x384xf32>
    %c0_66 = arith.constant 0 : index
    %c0_67 = arith.constant 0 : index
    %78 = vector.load %arg8[%c0_66, %c0_67] : memref<16x1xf32, #tpu.memory_space<vmem>>, vector<16x1xf32>
    %79 = vector.broadcast %78 : vector<16x1xf32> to vector<16x384xf32>
    %80 = arith.addf %77, %79 : vector<16x384xf32>
    %81 = arith.addf %80, %74 : vector<16x384xf32>
    %cst_68 = arith.constant 0.000000e+00 : f32
    %82 = vector.broadcast %cst_68 : f32 to vector<16x384xf32>
    %83 = arith.maximumf %81, %82 : vector<16x384xf32>
    %c0_69 = arith.constant 0 : index
    %c0_70 = arith.constant 0 : index
    %c0_71 = arith.constant 0 : index
    %84 = vector.load %arg9[%c0_69, %c0_70, %c0_71] : memref<1x16x384xf32, #tpu.memory_space<vmem>>, vector<1x16x384xf32>
    %85 = vector.shape_cast %84 : vector<1x16x384xf32> to vector<16x384xf32>
    %86 = vector.shape_cast %83 : vector<16x384xf32> to vector<1x16x384xf32>
    tpu.vector_store %arg9[%c0_69, %c0_70, %c0_71], %86 {strides = array<i32>} : memref<1x16x384xf32, #tpu.memory_space<vmem>>, vector<1x16x384xf32>,
    return
  }
  func.func @transform_0(%arg0: i32) -> (i32, i32, i32) {
    %c0_i32 = arith.constant 0 : i32
    %c0_i32_0 = arith.constant 0 : i32
    %c0_i32_1 = arith.constant 0 : i32
    return %arg0, %c0_i32, %c0_i32_0 : i32, i32, i32
  }
  func.func @transform_1(%arg0: i32) -> (i32, i32) {
    %c0_i32 = arith.constant 0 : i32
    %c0_i32_0 = arith.constant 0 : i32
    %c0_i32_1 = arith.constant 0 : i32
    return %c0_i32, %c0_i32_0 : i32, i32
  }
  func.func @transform_2(%arg0: i32) -> (i32, i32, i32) {
    %c0_i32 = arith.constant 0 : i32
    %c0_i32_0 = arith.constant 0 : i32
    %c0_i32_1 = arith.constant 0 : i32
    %c0_i32_2 = arith.constant 0 : i32
    return %c0_i32, %c0_i32_0, %c0_i32_1 : i32, i32, i32
  }
  func.func @transform_3(%arg0: i32) -> (i32, i32) {
    %c0_i32 = arith.constant 0 : i32
    %c0_i32_0 = arith.constant 0 : i32
    %c0_i32_1 = arith.constant 0 : i32
    return %c0_i32, %c0_i32_0 : i32, i32
  }
  func.func @transform_4(%arg0: i32) -> (i32, i32) {
    %c0_i32 = arith.constant 0 : i32
    %c0_i32_0 = arith.constant 0 : i32
    %c0_i32_1 = arith.constant 0 : i32
    return %c0_i32, %c0_i32_0 : i32, i32
  }
  func.func @transform_5(%arg0: i32) -> (i32, i32, i32) {
    %c0_i32 = arith.constant 0 : i32
    %c0_i32_0 = arith.constant 0 : i32
    %c0_i32_1 = arith.constant 0 : i32
    %c0_i32_2 = arith.constant 0 : i32
    return %c0_i32, %c0_i32_0, %c0_i32_1 : i32, i32, i32
  }
  func.func @transform_6(%arg0: i32) -> (i32, i32) {
    %c0_i32 = arith.constant 0 : i32
    %c0_i32_0 = arith.constant 0 : i32
    %c0_i32_1 = arith.constant 0 : i32
    return %c0_i32, %c0_i32_0 : i32, i32
  }
  func.func @transform_7(%arg0: i32) -> (i32, i32) {
    %c0_i32 = arith.constant 0 : i32
    %c0_i32_0 = arith.constant 0 : i32
    %c0_i32_1 = arith.constant 0 : i32
    return %c0_i32, %c0_i32_0 : i32, i32
  }
  func.func @transform_8(%arg0: i32) -> (i32, i32, i32) {
    %c0_i32 = arith.constant 0 : i32
    %c0_i32_0 = arith.constant 0 : i32
    %c0_i32_1 = arith.constant 0 : i32
    return %arg0, %c0_i32, %c0_i32_0 : i32, i32, i32
  }
}

</mosaic_0001>

<bundles_post_ra>
// kernel: basic_block_forward.1
= control target key start
LH: loop header
LB: loop body
LE: loop exit
PB: predicated region body
PF: predicated region fallthrough
CT: control target
= control target key end

     0   :  { %s1729_s27 = smov 0   ;;  %s2069_s0 = inlined_call_operand.vmem [shape: bf16[2,16,450], index: 0, kind: input, shape index: {}]   ;;  %s2070_s1 = inlined_call_operand.vmem [shape: f32[1,384], index: 1, kind: input, shape index: {}]   ;;  %s2071_s2 = inlined_call_operand.vmem [shape: bf16[3,16,48], index: 2, kind: input, shape index: {}]   ;;  %s2072_s3 = inlined_call_operand.vmem [shape: f32[16,1], index: 3, kind: input, shape index: {}]   ;;  %s2073_s4 = inlined_call_operand.vmem [shape: f32[16,1], index: 4, kind: input, shape index: {}]   ;;  %s2074_s5 = inlined_call_operand.vmem [shape: bf16[3,16,48], index: 5, kind: input, shape index: {}]   ;;  %s2075_s6 = inlined_call_operand.vmem [shape: f32[16,1], index: 6, kind: input, shape index: {}]   ;;  %s2076_s7 = inlined_call_operand.vmem [shape: f32[16,1], index: 7, kind: input, shape index: {}]   ;;  %s2077_s8 = inlined_call_operand.vmem [shape: f32[2,16,384], index: 8, kind: output, shape index: {}]  }
   0x1 LB: > { %s1458_s28 = sadd.s32 4294967295, %s1672_s27   ;;  %p1462_p0 = scmp.ge.s32.totalorder %s1672_s27, 1  ;;  %s1672_s27 = sphi %s1729_s27, %s18_s27  }
   0x2   : > { %p262_p1 = scmp.lt.s32.totalorder %s1672_s27, 3 }
   0x4   : > { %p263_p2 = pnand %p1462_p0, %p262_p1 }
   0x5   : > { %p296_p3 = scmp.lt.s32.totalorder (!%p263_p2), %s1458_s28, 1  ;;  %v1674_v0 = vmov (!%p263_p2), 0.0   ;;  %s1675_s11 = smov (!%p263_p2), 110   ;;  %vm336_vm0 = vcmask (!%p263_p2), 900096   ;;  %vm348_vm1 = vcmask (!%p263_p2), 752640   ;;  %v1679_v22 = vmov (!%p263_p2), 0  }
   0x6   : > { %266 = sbr.rel (%p263_p2) target bundleno = 1044 (0x414), region = 52  ;;  %1523 = vmatprep.subr.bf16.mxu1 (!%p263_p2), %v1674_v0  ;;  %s1676_s12 = smov (!%p263_p2), 92   ;;  %429 = vmatprep.mubr.bf16.mxu0 (!%p263_p2), %v1679_v22  ;;  %vm1680_vm2 = vmmov (!%p263_p2), 0   ;;  %v760_v24 = vld [vmem:[%s2072_s3] sm:$0xff] (!%p263_p2)  ;;  %v779_v25 = vld [vmem:[%s2073_s4 + $0x8] sm:$0xff] (!%p263_p2)  ;;  %vm510_vm3 = vcmask (!%p263_p2), 908288  }
   0x7   : > { %s1677_s13 = smov (!%p263_p2), 111   ;;  %s1678_s14 = smov (!%p263_p2), 109   ;;  %1529 = vmatprep.mubr.msk.bf16.mxu1 (!%p263_p2), %vm1680_vm2, %v1674_v0  ;;  %1635 = vset.pattern.permute.xlu1 (!%p263_p2), %v1679_v22  ;;  %v761_v26 = vld [vmem:[%s2072_s3 + $0x8] sm:$0xff] (!%p263_p2)  ;;  %v778_v27 = vld [vmem:[%s2073_s4] sm:$0xff] (!%p263_p2)  ;;  %vm393_vm4 = vcmask (!%p263_p2), 392192   ;;  %vm648_vm5 = vcmask (!%p263_p2), 891904  }
   0x8   : > { %1634 = vset.pattern.permute.xlu0 (!%p263_p2), %v1679_v22  ;;  %v1660_v52 = vld [vmem:[%s2071_s2 + $0x8] sm:$0xff] (!%p263_p2)   ;;  %s1683_s15 = smov (!%p263_p2), 17   ;;  %vm904_vm6 = vcmask (!%p263_p2), 146432   ;;  %vm1039_vm7 = vcmask (!%p263_p2), 154624   ;;  %vm1188_vm8 = vcmask (!%p263_p2), 138240  }
   0xd   : > { %s2079_s28 = smov (!%p296_p3, %s1458_s28), 1 }
   0xe   : > { %s1498_s29 = sshll.u32 %s2079_s28, 5  ;;  %s1615_s30 = smul.u32 48, %s2079_s28 }
   0xf   : > { %s300_s10 = scalar_lea.vmem %s2069_s0, %s1498_s29 }
  0x10   : > { %v1744_v1 = vld [vmem:[%s300_s10 + $0x8] sm:$0xff]  ;;  %v1746_v2 = vld [vmem:[%s300_s10 + $0x18] sm:$0xff]  ;;  %v1748_v3 = vld [vmem:[%s300_s10] sm:$0xff] }
  0x11   : > { %v1469_v4 = vcombine.high %v1744_v1, %v1746_v2  ;;  %v1752_v5 = vld [vmem:[%s300_s10 + $0x10] sm:$0xff]  ;;  %v1468_v8 = vcombine.low %v1744_v1, %v1746_v2  ;;  %s305_s10 = scalar_lea.vmem %s2077_s8, %s1615_s30 }
  0x12   : > { %v1467_v6 = vcombine.high %v1748_v3, %v1752_v5  ;;  %v1466_v7 = vcombine.low %v1748_v3, %v1752_v5 }
  0x13   : > { %334 = vrot.lane.b32.xlu1 %v1469_v4, %s1675_s11 }
  0x14   : > { %330 = vrot.lane.b32.xlu0 %v1467_v6, %s1675_s11 }
  0x17   : > { %328 = vrot.lane.b32.xlu1 %v1466_v7, %s1675_s11 }
  0x18   : > { %332 = vrot.lane.b32.xlu0 %v1468_v8, %s1675_s11 }
  0x1b   : > { %344 = vrot.lane.b32.xlu1 %v1468_v8, %s1676_s12 }
  0x1c   : > { %342 = vrot.lane.b32.xlu0 %v1467_v6, %s1676_s12 }
  0x1f   : > { %340 = vrot.lane.b32.xlu1 %v1466_v7, %s1676_s12 }
  0x20   : > { %346 = vrot.lane.b32.xlu0 %v1469_v4, %s1676_s12 }
  0x23   : > { %490 = vrot.lane.b32.xlu1 %v1468_v8, %s1677_s13 }
  0x24   : > { %488 = vrot.lane.b32.xlu0 %v1467_v6, %s1677_s13 }
  0x27   : > { %492 = vrot.lane.b32.xlu1 %v1469_v4, %s1677_s13 }
  0x28   : > { %486 = vrot.lane.b32.xlu0 %v1466_v7, %s1677_s13 }
  0x2b   : > { %628 = vrot.lane.b32.xlu1 %v1468_v8, %s1678_s14 }
  0x2c   : > { %626 = vrot.lane.b32.xlu0 %v1467_v6, %s1678_s14 }
  0x30   : > { %624 = vrot.lane.b32.xlu0 %v1466_v7, %s1678_s14 }
  0x85   : > { %v335_v9 = vpop.permute.xlu1 %334 }
  0x86   : > { %v331_v10 = vpop.permute.xlu0 %330  ;;  %368 = vrot.lane.b32.xlu1 %v335_v9, %s1675_s11 }
  0x89   : > { %v329_v11 = vpop.permute.xlu1 %328 }
  0x8a   : > { %v333_v12 = vpop.permute.xlu0 %332  ;;  %v337_v13 = vsel %vm336_vm0, %v329_v11, %v331_v10 }
  0x8b   : > { %v338_v14 = vsel %vm336_vm0, %v331_v10, %v333_v12  ;;  %v339_v15 = vsel %vm336_vm0, %v333_v12, %v335_v9 }
  0x8c   : > { %397 = vmatprep.subr.bf16.mxu0 %v338_v14  ;;  %1524 = vmatpush3.bf16.msra.mxu1 %v339_v15 }
  0x8d   : > { %364 = vrot.lane.b32.xlu0 %v338_v14, %s1675_s11  ;;  %398 = vmatpush1.bf16.msra.mxu0 %v337_v13  ;;  %v345_v17 = vpop.permute.xlu1 %344 }
  0x8e   : > { %v343_v16 = vpop.permute.xlu0 %342  ;;  %1525 = vmatprep.subr.bf16.mxu1 %v1674_v0 }
  0x8f   : > { %v350_v19 = vsel %vm348_vm1, %v343_v16, %v345_v17 }
  0x91   : > { %362 = vrot.lane.b32.xlu0 %v337_v13, %s1675_s11  ;;  %v341_v20 = vpop.permute.xlu1 %340 }
  0x92   : > { %v347_v18 = vpop.permute.xlu0 %346  ;;  %v349_v21 = vsel %vm348_vm1, %v341_v20, %v343_v16 }
  0x93   : > { %376 = vrot.lane.b32.xlu1 %v347_v18, %s1675_s11  ;;  %v351_v23 = vsel %vm348_vm1, %v345_v17, %v347_v18 }
  0x95   : > { %372 = vrot.lane.b32.xlu0 %v350_v19, %s1675_s11  ;;  %v491_v30 = vpop.permute.xlu1 %490 }
  0x96   : > { %v489_v28 = vpop.permute.xlu0 %488 }
  0x97   : > { %500 = vrot.lane.b32.xlu1 %v335_v9, %s1677_s13  ;;  %v512_v55 = vsel %vm510_vm3, %v489_v28, %v491_v30 }
  0x99   : > { %370 = vrot.lane.b32.xlu0 %v349_v21, %s1675_s11  ;;  %v493_v32 = vpop.permute.xlu1 %492 }
  0x9a   : > { %v487_v29 = vpop.permute.xlu0 %486  ;;  %v513_v57 = vsel %vm510_vm3, %v491_v30, %v493_v32 }
  0x9b   : > { %508 = vrot.lane.b32.xlu1 %v347_v18, %s1677_s13  ;;  %v511_v58 = vsel %vm510_vm3, %v487_v29, %v489_v28  ;;  %v803_v29 = vlaneseq }
  0x9d   : > { %496 = vrot.lane.b32.xlu0 %v338_v14, %s1677_s13  ;;  %v1828_v34 = vpop.permute.xlu1 %628  ;;  %v804_v32 = vshrl.u32 %v803_v29, 7 }
  0x9e   : > { %v1824_v31 = vpop.permute.xlu0 %626 }
  0x9f   : > { %366 = vrot.lane.b32.xlu1 %v339_v15, %s1675_s11  ;;  %v650_v12 = vsel %vm648_vm5, %v1824_v31, %v1828_v34 }
  0xa1   : > { %494 = vrot.lane.b32.xlu0 %v337_v13, %s1677_s13 }
  0xa2   : > { %v1826_v33 = vpop.permute.xlu0 %624 }
  0xa3   : > { %374 = vrot.lane.b32.xlu1 %v351_v23, %s1675_s11 }
  0xa5   : > { %504 = vrot.lane.b32.xlu0 %v350_v19, %s1677_s13 }
  0xa7   : > { %630 = vrot.lane.b32.xlu1 %v1469_v4, %s1678_s14 }
  0xa9   : > { %502 = vrot.lane.b32.xlu0 %v349_v21, %s1677_s13 }
  0xab   : > { %498 = vrot.lane.b32.xlu1 %v339_v15, %s1677_s13 }
  0xad   : > { %634 = vrot.lane.b32.xlu0 %v338_v14, %s1678_s14 }
  0xaf   : > { %506 = vrot.lane.b32.xlu1 %v351_v23, %s1677_s13  ;;  %s1681_s13 = smov 18  }
  0xb1   : > { %632 = vrot.lane.b32.xlu0 %v337_v13, %s1678_s14 }
  0xb3   : > { %638 = vrot.lane.b32.xlu1 %v335_v9, %s1678_s14  ;;  %v1661_v9 = vld [vmem:[%s2071_s2] sm:$0xff]  }
  0xb5   : > { %642 = vrot.lane.b32.xlu0 %v350_v19, %s1678_s14 }
  0xb7   : > { %636 = vrot.lane.b32.xlu1 %v339_v15, %s1678_s14  ;;  %v649_v15 = vsel %vm648_vm5, %v1826_v33, %v1824_v31 }
  0xb9   : > { %640 = vrot.lane.b32.xlu0 %v349_v21, %s1678_s14 }
  0xbb   : > { %644 = vrot.lane.b32.xlu1 %v351_v23, %s1678_s14 }
  0xbd   : > { %764 = vperm.xlu0 %1634, %v760_v24  }
  0xbf   : > { %646 = vrot.lane.b32.xlu1 %v347_v18, %s1678_s14  ;;  %s1682_s14 = smov 19  }
  0xc1   : > { %787 = vperm.xlu0 %1634, %v779_v25  }
  0xc3   : > { %769 = vperm.xlu1 %1635, %v761_v26   ;;  %v1662_v26 = vld [vmem:[%s2071_s2 + $0x10] sm:$0xff]  }
  0xc7   : > { %782 = vperm.xlu1 %1635, %v778_v27  }
  0xf8   : > { %v369_v36 = vpop.permute.xlu1 %368 }
  0xff   : > { %v365_v35 = vpop.permute.xlu0 %364 }
 0x103   : > { %v363_v37 = vpop.permute.xlu0 %362 }
 0x104   : > { %v378_v48 = vsel %vm336_vm0, %v363_v37, %v365_v35  ;;  %v805_v37 = vsub.s32 0, %v804_v32 }
 0x105   : > { %v377_v38 = vpop.permute.xlu1 %376 }
 0x107   : > { %v373_v39 = vpop.permute.xlu0 %372 }
 0x109   : > { %v501_v40 = vpop.permute.xlu1 %500 }
 0x10b   : > { %v371_v41 = vpop.permute.xlu0 %370 }
 0x10c   : > { %v381_v54 = vsel %vm336_vm0, %v371_v41, %v373_v39  ;;  %v307_v41 = vld [vmem:[%s2070_s1] sm:$0x7] }
 0x10d   : > { %v509_v42 = vpop.permute.xlu1 %508 }
 0x10f   : > { %v497_v43 = vpop.permute.xlu0 %496 }
 0x111   : > { %v367_v44 = vpop.permute.xlu1 %366 }
 0x112   : > { %v379_v45 = vsel %vm336_vm0, %v365_v35, %v367_v44  ;;  %v380_v46 = vsel %vm336_vm0, %v367_v44, %v369_v36 }
 0x113   : > { %v495_v47 = vpop.permute.xlu0 %494  ;;  %399 = vmatprep.subr.bf16.mxu0 %v379_v45  ;;  %1526 = vmatpush3.bf16.msra.mxu1 %v380_v46 }
 0x114   : > { %400 = vmatpush1.bf16.msra.mxu0 %v378_v48  ;;  %1527 = vmatprep.subr.bf16.mxu1 %v1674_v0  ;;  %v514_v63 = vsel %vm510_vm3, %v495_v47, %v497_v43 }
 0x115   : > { %v375_v49 = vpop.permute.xlu1 %374 }
 0x116   : > { %v382_v50 = vsel %vm336_vm0, %v373_v39, %v375_v49  ;;  %v383_v51 = vsel %vm336_vm0, %v375_v49, %v377_v38  ;;  %v809_v38 = vsub.s32 1, %v804_v32 }
 0x117   : > { %v505_v53 = vpop.permute.xlu0 %504  ;;  %401 = vmatprep.subr.bf16.mxu0 %v382_v50  ;;  %1528 = vmatpush3.bf16.msra.mxu1 %v383_v51  ;;  %v813_v50 = vsub.s32 2, %v804_v32 }
 0x118   : > { %402 = vmatpush1.bf16.msra.mxu0 %v381_v54  ;;  %1533 = vmatprep.subr.bf16.mxu1 %v1674_v0 }
 0x119   : > { %532 = vmatprep.subr.bf16.mxu0 %v512_v55  ;;  %v631_v56 = vpop.permute.xlu1 %630 }
 0x11a   : > { %1530 = vmatmul.mubr.msk.bf16.vlgmr.msra.gmra.mrb[0].mxu1 %vm393_vm4, %v1660_v52  ;;  %v651_v14 = vsel %vm648_vm5, %v1828_v34, %v631_v56 }
 0x11b   : > { %v503_v59 = vpop.permute.xlu0 %502  ;;  %1473 = vmatmul.mubr.msk.bf16.vlgmr.msra.gmra.mrb[0].mxu0 %vm393_vm4, %v1660_v52  ;;  %1534 = vmatpush3.bf16.msra.mxu1 %v513_v57  ;;  %v806_v52 = vrot.slane %v307_v41, %v805_v37 }
 0x11c   : > { %533 = vmatpush1.bf16.msra.mxu0 %v511_v58  ;;  %1535 = vmatprep.subr.bf16.mxu1 %v1674_v0  ;;  %v517_v10 = vsel %vm510_vm3, %v503_v59, %v505_v53 }
 0x11d   : > { %v499_v60 = vpop.permute.xlu1 %498  ;;  %564 = vmatprep.mubr.bf16.mxu0 %v1679_v22  ;;  %1539 = vmatprep.mubr.msk.bf16.mxu1 %vm1680_vm2, %v1674_v0 }
 0x11e   : > { %v516_v61 = vsel %vm510_vm3, %v499_v60, %v501_v40  ;;  %v515_v62 = vsel %vm510_vm3, %v497_v43, %v499_v60 }
 0x11f   : > { %v635_v4 = vpop.permute.xlu0 %634  ;;  %534 = vmatprep.subr.bf16.mxu0 %v515_v62  ;;  %1536 = vmatpush3.bf16.msra.mxu1 %v516_v61 }
 0x120   : > { %535 = vmatpush1.bf16.msra.mxu0 %v514_v63  ;;  %1537 = vmatprep.subr.bf16.mxu1 %v1674_v0 }
 0x121   : > { %v507_v6 = vpop.permute.xlu1 %506 }
 0x122   : > { %v519_v7 = vsel %vm510_vm3, %v507_v6, %v509_v42  ;;  %v518_v8 = vsel %vm510_vm3, %v505_v53, %v507_v6  ;;  %v810_v53 = vrot.slane %v307_v41, %v809_v38  ;;  %v814_v6 = vrot.slane %v307_v41, %v813_v50  ;;  %v1330_v50 = vld [vmem:[%s2076_s7] sm:$0xff] }
 0x123   : > { %v633_v11 = vpop.permute.xlu0 %632  ;;  %536 = vmatprep.subr.bf16.mxu0 %v518_v8  ;;  %1538 = vmatpush3.bf16.msra.mxu1 %v519_v7 }
 0x124   : > { %537 = vmatpush1.bf16.msra.mxu0 %v517_v10  ;;  %1543 = vmatprep.subr.bf16.mxu1 %v1674_v0  ;;  %v652_v20 = vsel %vm648_vm5, %v633_v11, %v635_v4 }
 0x125   : > { %670 = vmatprep.subr.bf16.mxu0 %v650_v12  ;;  %v639_v13 = vpop.permute.xlu1 %638 }
 0x126   : > { %1540 = vmatmul.mubr.msk.bf16.vlgmr.msra.gmra.mrb[0].mxu1 %vm393_vm4, %v1661_v9 }
 0x127   : > { %v643_v16 = vpop.permute.xlu0 %642  ;;  %1476 = vmatmul.mubr.msk.bf16.vlgmr.msra.gmra.mrb[0].mxu0 %vm393_vm4, %v1661_v9  ;;  %1544 = vmatpush3.bf16.msra.mxu1 %v651_v14 }
 0x128   : > { %671 = vmatpush1.bf16.msra.mxu0 %v649_v15  ;;  %1545 = vmatprep.subr.bf16.mxu1 %v1674_v0 }
 0x129   : > { %v637_v17 = vpop.permute.xlu1 %636  ;;  %702 = vmatprep.mubr.bf16.mxu0 %v1679_v22  ;;  %1549 = vmatprep.mubr.msk.bf16.mxu1 %vm1680_vm2, %v1674_v0 }
 0x12a   : > { %v654_v18 = vsel %vm648_vm5, %v637_v17, %v639_v13  ;;  %v653_v19 = vsel %vm648_vm5, %v635_v4, %v637_v17 }
 0x12b   : > { %672 = vmatprep.subr.bf16.mxu0 %v653_v19  ;;  %1546 = vmatpush3.bf16.msra.mxu1 %v654_v18  ;;  %v641_v21 = vpop.permute.xlu0 %640 }
 0x12c   : > { %673 = vmatpush1.bf16.msra.mxu0 %v652_v20  ;;  %1547 = vmatprep.subr.bf16.mxu1 %v1674_v0  ;;  %v655_v25 = vsel %vm648_vm5, %v641_v21, %v643_v16 }
 0x12d   : > { %v645_v23 = vpop.permute.xlu1 %644 }
 0x12e   : > { %v656_v24 = vsel %vm648_vm5, %v643_v16, %v645_v23 }
 0x12f   : > { %674 = vmatprep.subr.bf16.mxu0 %v656_v24 }
 0x130   : > { %675 = vmatpush1.bf16.msra.mxu0 %v655_v25 }
 0x131   : > { %v647_v27 = vpop.permute.xlu1 %646 }
 0x132   : > { %v657_v28 = vsel %vm648_vm5, %v645_v23, %v647_v27 }
 0x133   : > { %1481 = vmatmul.mubr.msk.bf16.vlgmr.msra.gmra.mrb[0].mxu0 %vm393_vm4, %v1662_v26  ;;  %1548 = vmatpush3.bf16.msra.mxu1 %v657_v28 }
 0x134   : > { %1553 = vmatprep.subr.bf16.mxu1 %v1674_v0  ;;  %958 = vmatprep.mubr.bf16.mxu0 %v1679_v22 }
 0x136   : > { %1550 = vmatmul.mubr.msk.bf16.vlgmr.msra.gmra.mrb[0].mxu1 %vm393_vm4, %v1662_v26 }
 0x137   : > { %1559 = vmatprep.mubr.msk.bf16.mxu1 %vm1680_vm2, %v1674_v0 }
 0x13c   : > { %v765_v31 = vpop.permute.xlu0 %764 }
 0x140   : > { %v788_v42 = vpop.permute.xlu0 %787 }
 0x142   : > { %v770_v30 = vpop.permute.xlu1 %769 }
 0x146   : > { %v783_v34 = vpop.permute.xlu1 %782 }
 0x206   : > { %v704_v33 = vpop.f32.mrb[0].mxu0 }
 0x207   : > { %v772_v35 = vmul.f32 %v765_v31, %v704_v33  ;;  %v706_v36 = vpop.f32.mrb[1].mxu0 }
 0x208   : > { %v773_v39 = vmul.f32 %v765_v31, %v706_v36  ;;  %v708_v40 = vpop.f32.mrb[2].mxu0 }
 0x209   : > { %v775_v43 = vmul.f32 %v770_v30, %v708_v40  ;;  %v790_v44 = vadd.f32 %v783_v34, %v772_v35  ;;  %v710_v45 = vpop.f32.mrb[3].mxu0  ;;  %v747_v46 = vpop.f32.mrb[0].mxu1 }
 0x20a   : > { %v791_v47 = vadd.f32 %v783_v34, %v773_v39  ;;  %v776_v48 = vmul.f32 %v770_v30, %v710_v45  ;;  %v774_v49 = vmul.f32 %v765_v31, %v747_v46  ;;  %v1551_v51 = vpop.f32.mrb[1].mxu1 }
 0x20b   : > { %v796_v54 = vmax.f32 %v790_v44, 0.0  ;;  %v793_v55 = vadd.f32 %v788_v42, %v775_v43  ;;  %v750_v56 = vpop.f32.mrb[2].mxu1  ;;  %v1331_v51 = vld [vmem:[%s2076_s7 + $0x8] sm:$0xff] }
 0x20c   : > { %v797_v57 = vmax.f32 %v791_v47, 0.0  ;;  %v794_v58 = vadd.f32 %v788_v42, %v776_v48  ;;  %v792_v59 = vadd.f32 %v783_v34, %v774_v49  ;;  %v777_v60 = vmul.f32 %v770_v30, %v750_v56  ;;  %v1552_v61 = vpop.f32.mrb[3].mxu1  ;;  %v1312_v48 = vld [vmem:[%s2075_s6] sm:$0xff]  ;;  %v1313_v49 = vld [vmem:[%s2075_s6 + $0x8] sm:$0xff] }
 0x20d   : > { %v799_v62 = vmax.f32 %v793_v55, 0.0  ;;  %v818_v8 = vmul.f32 %v806_v52, %v796_v54  ;;  %v1306_v54 = vunpack.c.l.bf16 %v1744_v1  ;;  %v1307_v55 = vunpack.c.h.bf16 %v1744_v1 }
 0x20e   : > { %v800_v63 = vmax.f32 %v794_v58, 0.0  ;;  %v798_v4 = vmax.f32 %v792_v59, 0.0  ;;  %v795_v7 = vadd.f32 %v788_v42, %v777_v60  ;;  %v819_v10 = vmul.f32 %v810_v53, %v797_v57 }
 0x20f   : > { %v821_v9 = vmul.f32 %v806_v52, %v799_v62  ;;  %v1304_v52 = vunpack.c.l.bf16 %v1748_v3  ;;  %v1308_v56 = vunpack.c.l.bf16 %v1752_v5  ;;  %v1309_v57 = vunpack.c.h.bf16 %v1752_v5 }
 0x210   : > { %v822_v11 = vmul.f32 %v810_v53, %v800_v63  ;;  %v801_v12 = vmax.f32 %v795_v7, 0.0  ;;  %v820_v15 = vmul.f32 %v814_v6, %v798_v4  ;;  %v1305_v53 = vunpack.c.h.bf16 %v1748_v3 }
 0x211   : > { %v826_v13 = vpack.c.bf16 %v821_v9, %v818_v8  ;;  %v1310_v58 = vunpack.c.l.bf16 %v1746_v2  ;;  %v1311_v59 = vunpack.c.h.bf16 %v1746_v2  ;;  %v1641_v61 = vpack.i.bf16 %v1307_v55, %v1306_v54 }
 0x212   : > { %v827_v14 = vpack.c.bf16 %v822_v11, %v819_v10  ;;  %v823_v16 = vmul.f32 %v814_v6, %v801_v12  ;;  %v1636_v60 = vpack.i.bf16 %v1305_v53, %v1304_v52  ;;  %v1646_v62 = vpack.i.bf16 %v1309_v57, %v1308_v56  ;;  %v1665_v57 = vld [vmem:[%s2074_s5 + $0x10] sm:$0xff]  }
 0x213   : > { %859 = vrot.lane.b32.xlu0 %v826_v13, %s1676_s12  ;;  %v1651_v3 = vpack.i.bf16 %v1311_v59, %v1310_v58 }
 0x214   : > { %v1895_v17 = vpack.c.bf16 %v823_v16, %v820_v15 }
 0x216   : > { %850 = vrot.lane.b32.xlu1 %v1895_v17, %s1675_s11 }
 0x217   : > { %848 = vrot.lane.b32.xlu0 %v827_v14, %s1675_s11 }
 0x21a   : > { %846 = vrot.lane.b32.xlu1 %v826_v13, %s1675_s11 }
 0x21b   : > { %863 = vrot.lane.b32.xlu0 %v1895_v17, %s1676_s12 }
 0x21e   : > { %861 = vrot.lane.b32.xlu1 %v827_v14, %s1676_s12 }
 0x21f   : > { %844 = vrot.lane.b32.xlu0 %v1679_v22, %s1675_s11 }
 0x222   : > { %865 = vrot.lane.b32.xlu1 %v1679_v22, %s1676_s12 }
 0x223   : > { %1151 = vrot.lane.b32.xlu0 %v1679_v22, %s1675_s11 }
 0x226   : > { %1145 = vrot.lane.b32.xlu1 %v826_v13, %s1675_s11 }
 0x227   : > { %886 = vrot.lane.b32.xlu0 %v1895_v17, %s1681_s13 }
 0x22a   : > { %1149 = vrot.lane.b32.xlu1 %v1895_v17, %s1675_s11 }
 0x22b   : > { %1147 = vrot.lane.b32.xlu0 %v827_v14, %s1675_s11 }
 0x22e   : > { %882 = vrot.lane.b32.xlu1 %v826_v13, %s1681_s13 }
 0x22f   : > { %1021 = vrot.lane.b32.xlu0 %v1895_v17, %s1682_s14 }
 0x232   : > { %880 = vrot.lane.b32.xlu1 %v1679_v22, %s1681_s13 }
 0x233   : > { %884 = vrot.lane.b32.xlu0 %v827_v14, %s1681_s13 }
 0x236   : > { %1017 = vrot.lane.b32.xlu1 %v826_v13, %s1682_s14 }
 0x237   : > { %1019 = vrot.lane.b32.xlu0 %v827_v14, %s1682_s14 }
 0x23a   : > { %1015 = vrot.lane.b32.xlu1 %v1679_v22, %s1682_s14 }
 0x23b   : > { %1168 = vrot.lane.b32.xlu0 %v827_v14, %s1683_s15 }
 0x23e   : > { %1166 = vrot.lane.b32.xlu1 %v826_v13, %s1683_s15 }
 0x285   : > { %v860_v18 = vpop.permute.xlu0 %859 }
 0x288   : > { %v851_v19 = vpop.permute.xlu1 %850 }
 0x289   : > { %894 = vrot.lane.b32.xlu0 %v851_v19, %s1681_s13  ;;  %v849_v20 = vpop.permute.xlu0 %848 }
 0x28a   : > { %v854_v35 = vsel %vm336_vm0, %v849_v20, %v851_v19 }
 0x28c   : > { %v847_v21 = vpop.permute.xlu1 %846 }
 0x28d   : > { %1029 = vrot.lane.b32.xlu0 %v851_v19, %s1682_s14  ;;  %v864_v23 = vpop.permute.xlu0 %863  ;;  %888 = vrot.lane.b32.xlu1 %v847_v21, %s1681_s13  ;;  %v853_v33 = vsel %vm336_vm0, %v847_v21, %v849_v20 }
 0x290   : > { %v862_v24 = vpop.permute.xlu1 %861 }
 0x291   : > { %v845_v25 = vpop.permute.xlu0 %844  ;;  %896 = vrot.lane.b32.xlu1 %v860_v18, %s1681_s13  ;;  %v867_v37 = vsel %vm348_vm1, %v860_v18, %v862_v24  ;;  %v868_v39 = vsel %vm348_vm1, %v862_v24, %v864_v23  ;;  %v1663_v24 = vld [vmem:[%s2074_s5 + $0x8] sm:$0xff]  }
 0x292   : > { %v852_v30 = vsel %vm336_vm0, %v845_v25, %v847_v21 }
 0x294   : > { %v866_v26 = vpop.permute.xlu1 %865 }
 0x295   : > { %v1152_v27 = vpop.permute.xlu0 %1151  ;;  %1031 = vrot.lane.b32.xlu1 %v860_v18, %s1682_s14  ;;  %v869_v28 = vsel %vm348_vm1, %v864_v23, %v866_v26 }
 0x296   : > { %902 = vrot.lane.b32.xlu0 %v869_v28, %s1681_s13 }
 0x298   : > { %v1146_v29 = vpop.permute.xlu1 %1145 }
 0x299   : > { %v887_v31 = vpop.permute.xlu0 %886  ;;  %1023 = vrot.lane.b32.xlu1 %v852_v30, %s1682_s14 }
 0x29a   : > { %1037 = vrot.lane.b32.xlu0 %v869_v28, %s1682_s14 }
 0x29c   : > { %v1150_v32 = vpop.permute.xlu1 %1149 }
 0x29d   : > { %v1148_v34 = vpop.permute.xlu0 %1147  ;;  %890 = vrot.lane.b32.xlu1 %v853_v33, %s1681_s13  ;;  %v1155_v45 = vsel %vm336_vm0, %v1150_v32, %v1152_v27 }
 0x29e   : > { %892 = vrot.lane.b32.xlu0 %v854_v35, %s1681_s13  ;;  %v1153_v46 = vsel %vm336_vm0, %v1146_v29, %v1148_v34  ;;  %v1154_v47 = vsel %vm336_vm0, %v1148_v34, %v1150_v32 }
 0x2a0   : > { %v883_v36 = vpop.permute.xlu1 %882 }
 0x2a1   : > { %v1943_v38 = vpop.permute.xlu0 %1021  ;;  %898 = vrot.lane.b32.xlu1 %v867_v37, %s1681_s13 }
 0x2a2   : > { %900 = vrot.lane.b32.xlu0 %v868_v39, %s1681_s13 }
 0x2a4   : > { %v881_v40 = vpop.permute.xlu1 %880 }
 0x2a5   : > { %v885_v41 = vpop.permute.xlu0 %884  ;;  %1164 = vrot.lane.b32.xlu1 %v1679_v22, %s1683_s15  ;;  %v905_v44 = vsel %vm904_vm6, %v881_v40, %v883_v36  ;;  %v1664_v40 = vld [vmem:[%s2074_s5] sm:$0xff]  }
 0x2a6   : > { %v907_v42 = vsel %vm904_vm6, %v885_v41, %v887_v31  ;;  %1170 = vrot.lane.b32.xlu0 %v1895_v17, %s1683_s15  ;;  %v906_v43 = vsel %vm904_vm6, %v883_v36, %v885_v41 }
 0x2a7   : > { %926 = vmatprep.subr.bf16.mxu0 %v906_v43  ;;  %1554 = vmatpush3.bf16.msra.mxu1 %v907_v42 }
 0x2a8   : > { %927 = vmatpush1.bf16.msra.mxu0 %v905_v44  ;;  %1555 = vmatprep.subr.bf16.mxu1 %v1674_v0  ;;  %v1018_v1 = vpop.permute.xlu1 %1017 }
 0x2a9   : > { %1025 = vrot.lane.b32.xlu1 %v853_v33, %s1682_s14  ;;  %v1020_v63 = vpop.permute.xlu0 %1019 }
 0x2aa   : > { %1027 = vrot.lane.b32.xlu0 %v854_v35, %s1682_s14  ;;  %v1041_v27 = vsel %vm1039_vm7, %v1018_v1, %v1020_v63 }
 0x2ac   : > { %v1016_v4 = vpop.permute.xlu1 %1015 }
 0x2ad   : > { %1033 = vrot.lane.b32.xlu1 %v867_v37, %s1682_s14  ;;  %v1995_v5 = vpop.permute.xlu0 %1168  ;;  %v1040_v30 = vsel %vm1039_vm7, %v1016_v4, %v1018_v1 }
 0x2ae   : > { %1035 = vrot.lane.b32.xlu0 %v868_v39, %s1682_s14 }
 0x2b0   : > { %v1997_v6 = vpop.permute.xlu1 %1166 }
 0x2b1   : > { %1172 = vrot.lane.b32.xlu1 %v1146_v29, %s1683_s15  ;;  %v1042_v29 = vsel %vm1039_vm7, %v1020_v63, %v1943_v38  ;;  %v1190_v43 = vsel %vm1188_vm8, %v1997_v6, %v1995_v5 }
 0x2b2   : > { %1178 = vrot.lane.b32.xlu0 %v1155_v45, %s1683_s15 }
 0x2b5   : > { %1174 = vrot.lane.b32.xlu1 %v1153_v46, %s1683_s15 }
 0x2b6   : > { %1176 = vrot.lane.b32.xlu0 %v1154_v47, %s1683_s15 }
 0x2b9   : > { %1182 = vrot.lane.b32.xlu1 %v867_v37, %s1683_s15 }
 0x2ba   : > { %1184 = vrot.lane.b32.xlu0 %v868_v39, %s1683_s15 }
 0x2bd   : > { %1180 = vrot.lane.b32.xlu1 %v860_v18, %s1683_s15 }
 0x2be   : > { %1186 = vrot.lane.b32.xlu0 %v869_v28, %s1683_s15 }
 0x2c1   : > { %1316 = vperm.xlu1 %1635, %v1312_v48  }
 0x2c2   : > { %1321 = vperm.xlu0 %1634, %v1313_v49  }
 0x2c5   : > { %1334 = vperm.xlu1 %1635, %v1330_v50  }
 0x2c6   : > { %1339 = vperm.xlu0 %1634, %v1331_v51  }
 0x2c9   : > { %1637 = vrot.lane.b32.xlu1 %v1636_v60, %s1676_s12 }
 0x2ca   : > { %1642 = vrot.lane.b32.xlu0 %v1641_v61, %s1676_s12 }
 0x2cd   : > { %1647 = vrot.lane.b32.xlu1 %v1646_v62, %s1676_s12 }
 0x2ce   : > { %1652 = vrot.lane.b32.xlu0 %v1651_v3, %s1676_s12 }
 0x2fb   : > { %v895_v2 = vpop.permute.xlu0 %894 }
 0x2ff   : > { %v889_v7 = vpop.permute.xlu1 %888  ;;  %v1030_v9 = vpop.permute.xlu0 %1029 }
 0x303   : > { %v897_v8 = vpop.permute.xlu1 %896 }
 0x307   : > { %v1032_v10 = vpop.permute.xlu1 %1031 }
 0x308   : > { %v903_v11 = vpop.permute.xlu0 %902 }
 0x30b   : > { %v1024_v12 = vpop.permute.xlu1 %1023 }
 0x30c   : > { %v1038_v13 = vpop.permute.xlu0 %1037 }
 0x30f   : > { %v891_v14 = vpop.permute.xlu1 %890 }
 0x310   : > { %v893_v15 = vpop.permute.xlu0 %892  ;;  %v908_v18 = vsel %vm904_vm6, %v889_v7, %v891_v14 }
 0x311   : > { %v910_v16 = vsel %vm904_vm6, %v893_v15, %v895_v2  ;;  %v909_v17 = vsel %vm904_vm6, %v891_v14, %v893_v15 }
 0x312   : > { %928 = vmatprep.subr.bf16.mxu0 %v909_v17  ;;  %1556 = vmatpush3.bf16.msra.mxu1 %v910_v16 }
 0x313   : > { %929 = vmatpush1.bf16.msra.mxu0 %v908_v18  ;;  %v899_v19 = vpop.permute.xlu1 %898  ;;  %1557 = vmatprep.subr.bf16.mxu1 %v1674_v0 }
 0x314   : > { %v901_v20 = vpop.permute.xlu0 %900  ;;  %v911_v25 = vsel %vm904_vm6, %v897_v8, %v899_v19 }
 0x315   : > { %v913_v21 = vsel %vm904_vm6, %v901_v20, %v903_v11  ;;  %v912_v23 = vsel %vm904_vm6, %v899_v19, %v901_v20 }
 0x316   : > { %930 = vmatprep.subr.bf16.mxu0 %v912_v23  ;;  %1558 = vmatpush3.bf16.msra.mxu1 %v913_v21 }
 0x317   : > { %931 = vmatpush1.bf16.msra.mxu0 %v911_v25  ;;  %v1165_v26 = vpop.permute.xlu1 %1164  ;;  %1563 = vmatprep.subr.bf16.mxu1 %v1674_v0 }
 0x318   : > { %v1171_v28 = vpop.permute.xlu0 %1170  ;;  %1061 = vmatprep.subr.bf16.mxu0 %v1041_v27  ;;  %v1189_v46 = vsel %vm1188_vm8, %v1165_v26, %v1997_v6 }
 0x319   : > { %1560 = vmatmul.mubr.msk.bf16.vlgmr.msra.gmra.mrb[4].mxu1 %vm393_vm4, %v1663_v24  ;;  %v1191_v45 = vsel %vm1188_vm8, %v1995_v5, %v1171_v28 }
 0x31a   : > { %1564 = vmatpush3.bf16.msra.mxu1 %v1042_v29  ;;  %1486 = vmatmul.mubr.msk.bf16.vlgmr.msra.gmra.mrb[4].mxu0 %vm393_vm4, %v1663_v24 }
 0x31b   : > { %1062 = vmatpush1.bf16.msra.mxu0 %v1040_v30  ;;  %v1026_v31 = vpop.permute.xlu1 %1025  ;;  %1565 = vmatprep.subr.bf16.mxu1 %v1674_v0 }
 0x31c   : > { %v1028_v32 = vpop.permute.xlu0 %1027  ;;  %1569 = vmatprep.mubr.msk.bf16.mxu1 %vm1680_vm2, %v1674_v0  ;;  %1093 = vmatprep.mubr.bf16.mxu0 %v1679_v22  ;;  %v1043_v35 = vsel %vm1039_vm7, %v1024_v12, %v1026_v31 }
 0x31d   : > { %v1045_v33 = vsel %vm1039_vm7, %v1028_v32, %v1030_v9  ;;  %v1044_v34 = vsel %vm1039_vm7, %v1026_v31, %v1028_v32 }
 0x31e   : > { %1063 = vmatprep.subr.bf16.mxu0 %v1044_v34  ;;  %1566 = vmatpush3.bf16.msra.mxu1 %v1045_v33 }
 0x31f   : > { %1064 = vmatpush1.bf16.msra.mxu0 %v1043_v35  ;;  %v1034_v36 = vpop.permute.xlu1 %1033  ;;  %1567 = vmatprep.subr.bf16.mxu1 %v1674_v0 }
 0x320   : > { %v1036_v37 = vpop.permute.xlu0 %1035  ;;  %v1046_v41 = vsel %vm1039_vm7, %v1032_v10, %v1034_v36 }
 0x321   : > { %v1048_v38 = vsel %vm1039_vm7, %v1036_v37, %v1038_v13  ;;  %v1047_v39 = vsel %vm1039_vm7, %v1034_v36, %v1036_v37 }
 0x322   : > { %1065 = vmatprep.subr.bf16.mxu0 %v1047_v39  ;;  %1568 = vmatpush3.bf16.msra.mxu1 %v1048_v38 }
 0x323   : > { %1066 = vmatpush1.bf16.msra.mxu0 %v1046_v41  ;;  %v1173_v42 = vpop.permute.xlu1 %1172  ;;  %1573 = vmatprep.subr.bf16.mxu1 %v1674_v0 }
 0x324   : > { %v1179_v44 = vpop.permute.xlu0 %1178  ;;  %1210 = vmatprep.subr.bf16.mxu0 %v1190_v43 }
 0x325   : > { %1570 = vmatmul.mubr.msk.bf16.vlgmr.msra.gmra.mrb[4].mxu1 %vm393_vm4, %v1664_v40 }
 0x326   : > { %1574 = vmatpush3.bf16.msra.mxu1 %v1191_v45  ;;  %1489 = vmatmul.mubr.msk.bf16.vlgmr.msra.gmra.mrb[4].mxu0 %vm393_vm4, %v1664_v40 }
 0x327   : > { %1211 = vmatpush1.bf16.msra.mxu0 %v1189_v46  ;;  %v1175_v47 = vpop.permute.xlu1 %1174  ;;  %1575 = vmatprep.subr.bf16.mxu1 %v1674_v0 }
 0x328   : > { %v1177_v48 = vpop.permute.xlu0 %1176  ;;  %1242 = vmatprep.mubr.bf16.mxu0 %v1679_v22  ;;  %1579 = vmatprep.mubr.msk.bf16.mxu1 %vm1680_vm2, %v1674_v0  ;;  %v1192_v51 = vsel %vm1188_vm8, %v1173_v42, %v1175_v47 }
 0x329   : > { %v1194_v49 = vsel %vm1188_vm8, %v1177_v48, %v1179_v44  ;;  %v1193_v50 = vsel %vm1188_vm8, %v1175_v47, %v1177_v48 }
 0x32a   : > { %1212 = vmatprep.subr.bf16.mxu0 %v1193_v50  ;;  %1576 = vmatpush3.bf16.msra.mxu1 %v1194_v49 }
 0x32b   : > { %1213 = vmatpush1.bf16.msra.mxu0 %v1192_v51  ;;  %v1183_v52 = vpop.permute.xlu1 %1182  ;;  %1577 = vmatprep.subr.bf16.mxu1 %v1674_v0 }
 0x32c   : > { %v1185_v53 = vpop.permute.xlu0 %1184 }
 0x32d   : > { %v1196_v54 = vsel %vm1188_vm8, %v1183_v52, %v1185_v53 }
 0x32e   : > { %1214 = vmatprep.subr.bf16.mxu0 %v1196_v54 }
 0x32f   : > { %v1181_v22 = vpop.permute.xlu1 %1180 }
 0x330   : > { %v1195_v55 = vsel %vm1188_vm8, %v1181_v22, %v1183_v52  ;;  %v1187_v56 = vpop.permute.xlu0 %1186 }
 0x331   : > { %v1197_v58 = vsel %vm1188_vm8, %v1185_v53, %v1187_v56  ;;  %1215 = vmatpush1.bf16.msra.mxu0 %v1195_v55 }
 0x332   : > { %1578 = vmatpush3.bf16.msra.mxu1 %v1197_v58 }
 0x334   : > { %1494 = vmatmul.mubr.msk.bf16.vlgmr.msra.gmra.mrb[4].mxu0 %vm393_vm4, %v1665_v57 }
 0x335   : > { %1580 = vmatmul.mubr.msk.bf16.vlgmr.msra.gmra.mrb[4].mxu1 %vm393_vm4, %v1665_v57 }
 0x340   : > { %v1317_v0 = vpop.permute.xlu1 %1316 }
 0x341   : > { %v1322_v59 = vpop.permute.xlu0 %1321 }
 0x344   : > { %v1335_v60 = vpop.permute.xlu1 %1334 }
 0x345   : > { %v1340_v61 = vpop.permute.xlu0 %1339 }
 0x348   : > { %v1638_v62 = vpop.permute.xlu1 %1637 }
 0x349   : > { %v1643_v3 = vpop.permute.xlu0 %1642  ;;  %v1640_v63 = vunpack.i.h.bf16 %v1638_v62  ;;  %v1639_v4 = vunpack.i.l.bf16 %v1638_v62 }
 0x34a   : > { %v1644_v5 = vunpack.i.l.bf16 %v1643_v3  ;;  %v1645_v2 = vunpack.i.h.bf16 %v1643_v3 }
 0x34b   : > { %v1373_v15 = vsel %vm348_vm1, %v1639_v4, %v1640_v63 }
 0x34c   : > { %v1648_v1 = vpop.permute.xlu1 %1647  ;;  %v1374_v17 = vsel %vm348_vm1, %v1640_v63, %v1644_v5  ;;  %v1375_v23 = vsel %vm348_vm1, %v1644_v5, %v1645_v2 }
 0x34d   : > { %v1653_v6 = vpop.permute.xlu0 %1652  ;;  %v1650_v7 = vunpack.i.h.bf16 %v1648_v1  ;;  %v1649_v8 = vunpack.i.l.bf16 %v1648_v1 }
 0x34e   : > { %v1655_v13 = vunpack.i.h.bf16 %v1653_v6  ;;  %v1654_v14 = vunpack.i.l.bf16 %v1653_v6 }
 0x34f   : > { %v1376_v27 = vsel %vm348_vm1, %v1649_v8, %v1650_v7 }
 0x350   : > { %v1377_v35 = vsel %vm348_vm1, %v1650_v7, %v1654_v14  ;;  %v1378_v36 = vsel %vm348_vm1, %v1654_v14, %v1655_v13 }
 0x407   : > { %v1244_v9 = vpop.f32.mrb[4].mxu0 }
 0x408   : > { %v1324_v10 = vmul.f32 %v1317_v0, %v1244_v9  ;;  %v1246_v11 = vpop.f32.mrb[5].mxu0  ;;  %v1287_v12 = vpop.f32.mrb[4].mxu1 }
 0x409   : > { %v1325_v16 = vmul.f32 %v1317_v0, %v1246_v11  ;;  %v1326_v18 = vmul.f32 %v1317_v0, %v1287_v12  ;;  %v1248_v19 = vpop.f32.mrb[6].mxu0  ;;  %v1581_v20 = vpop.f32.mrb[5].mxu1 }
 0x40a   : > { %v1342_v21 = vadd.f32 %v1335_v60, %v1324_v10  ;;  %v1327_v24 = vmul.f32 %v1322_v59, %v1248_v19  ;;  %v1250_v25 = vpop.f32.mrb[7].mxu0  ;;  %v1290_v26 = vpop.f32.mrb[6].mxu1 }
 0x40b   : > { %v1343_v28 = vadd.f32 %v1335_v60, %v1325_v16  ;;  %v1344_v29 = vadd.f32 %v1335_v60, %v1326_v18  ;;  %v1328_v30 = vmul.f32 %v1322_v59, %v1250_v25  ;;  %v1329_v31 = vmul.f32 %v1322_v59, %v1290_v26  ;;  %v1582_v32 = vpop.f32.mrb[7].mxu1 }
 0x40c   : > { %v1385_v33 = vadd.f32 %v1373_v15, %v1342_v21  ;;  %v1345_v34 = vadd.f32 %v1340_v61, %v1327_v24 }
 0x40d   : > { %v1386_v37 = vadd.f32 %v1374_v17, %v1343_v28  ;;  %v1387_v38 = vadd.f32 %v1375_v23, %v1344_v29  ;;  %v1346_v39 = vadd.f32 %v1340_v61, %v1328_v30  ;;  %v1347_v40 = vadd.f32 %v1340_v61, %v1329_v31 }
 0x40e   : > { %v1391_v41 = vmax.f32 %v1385_v33, 0.0  ;;  %v1388_v42 = vadd.f32 %v1376_v27, %v1345_v34 }
 0x40f   : > { %v1392_v43 = vmax.f32 %v1386_v37, 0.0  ;;  %v1393_v44 = vmax.f32 %v1387_v38, 0.0  ;;  %v1389_v45 = vadd.f32 %v1377_v35, %v1346_v39  ;;  %v1390_v46 = vadd.f32 %v1378_v36, %v1347_v40 }
 0x410   : > { %1397 = vst [vmem:[%s305_s10] sm:$0xff] %v1391_v41  ;;  %v1394_v47 = vmax.f32 %v1388_v42, 0.0 }
 0x411   : > { %1398 = vst [vmem:[%s305_s10 + $0x8] sm:$0xff] %v1392_v43  ;;  %1399 = vst [vmem:[%s305_s10 + $0x10] sm:$0xff] %v1393_v44  ;;  %v1395_v48 = vmax.f32 %v1389_v45, 0.0  ;;  %v1396_v49 = vmax.f32 %v1390_v46, 0.0 }
 0x412   : > { %1400 = vst [vmem:[%s305_s10 + $0x18] sm:$0xff] %v1394_v47 }
 0x413   : > { %1401 = vst [vmem:[%s305_s10 + $0x20] sm:$0xff] %v1395_v48  ;;  %1402 = vst [vmem:[%s305_s10 + $0x28] sm:$0xff] %v1396_v49 }
 0x414 PF: > { %s18_s27 = sadd.s32 1, %s1672_s27  }
 0x415   : > { %p15_p4 = scmp.ge.s32.totalorder %s18_s27, 4  }
 0x417   :  { %17 = sbr.rel (!%p15_p4) target bundleno = 1 (0x1), region = 86 }

</bundles_post_ra>
